<compile_context>
chip_gen: v5e
topology: v5e:2x2
jax: 0.10.0
libtpu: 0.0.40
codegen_flags: <defaults>
</compile_context>

<pallas_src>
import functools

import jax
import jax.numpy as jnp
from jax.experimental import pallas as pl
from jax.experimental.pallas import tpu as pltpu

OUT_H, OUT_W = 256, 128
MEANS = (103.94, 116.78, 123.68)
STD = (57.38, 57.12, 58.4)
# Per-output-channel constant offset mean/std in the reversed (RGB) channel order;
# the 1/std scale itself is folded into the column-interp matrix.
OFFS = tuple(float(MEANS[2 - c] / STD[2 - c]) for c in range(3))


def make_interp_matrix(out_size: int, in_size: int) -> jnp.ndarray:
    """Row-stochastic (out_size, in_size) matrix implementing 1-D bilinear
    interpolation with PyTorch align_corners=False semantics."""
    scale = in_size / out_size
    o = jnp.arange(out_size, dtype=jnp.float32)
    src = (o + 0.5) * scale - 0.5
    src = jnp.maximum(src, 0.0)               # PyTorch clamps negative source coords
    x0 = jnp.floor(src).astype(jnp.int32)
    x0 = jnp.clip(x0, 0, in_size - 1)
    x1 = jnp.minimum(x0 + 1, in_size - 1)
    lam = src - x0.astype(jnp.float32)
    rows = jnp.arange(out_size)
    m = jnp.zeros((out_size, in_size), jnp.float32)
    m = m.at[rows, x0].add(1.0 - lam)
    m = m.at[rows, x1].add(lam)
    return m


def _build_weights(H: int, W: int, H_pad: int):
    """Row-interp matrix (256, H_pad) and fused column-interp matrix (3W, 384)."""
    wh = make_interp_matrix(OUT_H, H)                          # (256, H)
    if H_pad != H:
        # Zero columns in the padded region so partial edge tiles contribute zero.
        wh = jnp.pad(wh, ((0, 0), (0, H_pad - H)))

    # wcol[w*3 + c_src, c_out*128 + j] = Ww[j, w] / STD[c_src],  c_src = 2 - c_out.
    ww_t = make_interp_matrix(OUT_W, W).T                      # (W, 128)
    wcol = jnp.zeros((3 * W, 3 * OUT_W), jnp.float32)
    for c_out in range(3):
        c_src = 2 - c_out
        wcol = wcol.at[c_src::3, c_out * OUT_W:(c_out + 1) * OUT_W].set(
            ww_t / STD[c_src])
    return wcol, wh


def _single_tile_kernel(x_ref, wcol_ref, wh_ref, o_ref):
    # x_ref   : (H, 3W)        NHWC rows, channels interleaved along lanes
    # wcol_ref: (3W, 384)      column interp (de-interleave + reversal + 1/std)
    # wh_ref  : (256, H)       row interp
    # o_ref   : (3, 256, 128)  output block (already channel-reversed NCHW)
    tmp = jnp.dot(x_ref[...], wcol_ref[...], preferred_element_type=jnp.float32)
    big = jnp.dot(wh_ref[...], tmp, preferred_element_type=jnp.float32)     # (256, 384)
    for c in range(3):
        o_ref[c, :, :] = big[:, c * OUT_W:(c + 1) * OUT_W] - OFFS[c]


def _tiled_kernel(x_ref, wcol_ref, wh_ref, o_ref, acc_ref, *, KH, TH, H, need_mask):
    # Same as above but with an H-tile reduction axis and f32 accumulator scratch.
    k = pl.program_id(1)

    @pl.when(k == 0)
    def _init():
        acc_ref[...] = jnp.zeros_like(acc_ref)

    x = x_ref[...]
    if need_mask:
        # Zero rows past the true image height on the (partial) last tile
        # (guards against NaNs in out-of-bounds reads; wh's zero columns cover
        # finite garbage already).
        row = jax.lax.broadcasted_iota(jnp.int32, (TH, 1), 0) + k * TH
        x = jnp.where(row < H, x, 0.0)

    tmp = jnp.dot(x, wcol_ref[...], preferred_element_type=jnp.float32)     # (TH, 384)
    acc_ref[...] += jnp.dot(wh_ref[...], tmp,
                            preferred_element_type=jnp.float32)             # (256, 384)

    @pl.when(k == KH - 1)
    def _finalize():
        big = acc_ref[...]
        for c in range(3):
            o_ref[c, :, :] = big[:, c * OUT_W:(c + 1) * OUT_W] - OFFS[c]


def fast_base_transform(img: jnp.ndarray, *,
                        tile_budget_bytes: int = 8 * 1024 * 1024) -> jnp.ndarray:
    """img: NHWC float (N, H, W, 3). Returns NCHW float32 (N, 3, 256, 128)."""
    N, H, W, C = img.shape
    assert C == 3, "expects 3-channel input"

    # Free view of the NHWC image: (N, H, 3W), last-dim index = w*3 + c_in.
    # No transpose, no extra HBM round trip.
    x_flat = jnp.reshape(img.astype(jnp.float32), (N, H, 3 * W))

    # --- H tiling: keep the (TH, 3W) input block inside a VMEM budget. ---
    row_bytes = 3 * W * 4
    plane_bytes = H * row_bytes
    if plane_bytes <= tile_budget_bytes or H <= 256:
        TH = H                                    # single block along H
    else:
        TH = 256 if 256 * row_bytes <= tile_budget_bytes else 128   # multiple of 128
        # TODO(synk): add a W-tiling path for ultra-wide planes where even 128 rows
        # exceed the VMEM budget.
    KH = pl.cdiv(H, TH)
    H_pad = KH * TH
    need_mask = (H % TH) != 0

    wcol, wh = _build_weights(H, W, H_pad)
    out_shape = jax.ShapeDtypeStruct((N, 3, OUT_H, OUT_W), jnp.float32)

    if KH == 1:
        return pl.pallas_call(
            _single_tile_kernel,
            out_shape=out_shape,
            grid=(N,),
            in_specs=[
                pl.BlockSpec((None, H, 3 * W), lambda n: (n, 0, 0)),
                pl.BlockSpec((3 * W, 3 * OUT_W), lambda n: (0, 0)),
                pl.BlockSpec((OUT_H, H), lambda n: (0, 0)),
            ],
            out_specs=pl.BlockSpec((None, 3, OUT_H, OUT_W), lambda n: (n, 0, 0, 0)),
            compiler_params=pltpu.CompilerParams(
                dimension_semantics=("parallel",),
                vmem_limit_bytes=48 * 1024 * 1024,
            ),
        )(x_flat, wcol, wh)

    kern = functools.partial(_tiled_kernel, KH=KH, TH=TH, H=H, need_mask=need_mask)
    return pl.pallas_call(
        kern,
        out_shape=out_shape,
        grid=(N, KH),
        in_specs=[
            pl.BlockSpec((None, TH, 3 * W), lambda n, k: (n, k, 0)),
            pl.BlockSpec((3 * W, 3 * OUT_W), lambda n, k: (0, 0)),
            pl.BlockSpec((OUT_H, TH), lambda n, k: (0, k)),
        ],
        out_specs=pl.BlockSpec((None, 3, OUT_H, OUT_W), lambda n, k: (n, 0, 0, 0)),
        scratch_shapes=[pltpu.VMEM((OUT_H, 3 * OUT_W), jnp.float32)],
        compiler_params=pltpu.CompilerParams(
            dimension_semantics=("parallel", "arbitrary"),
            vmem_limit_bytes=48 * 1024 * 1024,
        ),
    )(x_flat, wcol, wh)


def fast_base_transform_ref(img: jnp.ndarray) -> jnp.ndarray:
    """Pure-JAX reference using the same interpolation matrices."""
    N, H, W, C = img.shape
    x = jnp.transpose(img, (0, 3, 1, 2)).astype(jnp.float32)     # (N, 3, H, W)
    wh = make_interp_matrix(OUT_H, H)
    ww = make_interp_matrix(OUT_W, W)
    up = jnp.einsum("Oh,nchw,Ww->ncOW", wh, x, ww)               # (N, 3, 256, 128)
    mean = jnp.asarray(MEANS, jnp.float32)[None, :, None, None]
    std = jnp.asarray(STD, jnp.float32)[None, :, None, None]
    norm = (up - mean) / std
    return norm[:, ::-1, :, :]


if __name__ == "__main__":
    key = jax.random.PRNGKey(0)
    k1, k2 = jax.random.split(key)

    # 1) Small, single-tile (no-scratch) path.
    img = jax.random.uniform(k1, (2, 16, 16, 3), jnp.float32, 0.0, 255.0)
    out = jax.block_until_ready(fast_base_transform(img))
    assert out.shape == (2, 3, OUT_H, OUT_W)
    ref = fast_base_transform_ref(img)
    assert jnp.allclose(out, ref, rtol=1e-4, atol=2e-3), "single-tile path mismatch"

    # 2) Force the H-tiled + masked accumulator path with a tiny tile budget.
    img2 = jax.random.uniform(k2, (1, 300, 40, 3), jnp.float32, 0.0, 255.0)
    out2 = jax.block_until_ready(
        fast_base_transform(img2, tile_budget_bytes=64 * 1024))
    ref2 = fast_base_transform_ref(img2)
    assert out2.shape == (1, 3, OUT_H, OUT_W)
    assert jnp.allclose(out2, ref2, rtol=1e-4, atol=2e-3), "tiled path mismatch"

    print("KERNEL_OK")
</pallas_src>

<mosaic_0001>
module attributes {stable_mosaic.version = 11 : i64} {
  func.func @_single_tile_kernel(%arg0: i32, %arg1: memref<1x16x48xf32, #tpu.memory_space<vmem>>, %arg2: memref<48x384xf32, #tpu.memory_space<vmem>>, %arg3: memref<256x16xf32, #tpu.memory_space<vmem>>, %arg4: memref<1x3x256x128xf32, #tpu.memory_space<vmem>>) attributes {dimension_semantics = [#tpu.dimension_semantics<parallel>], iteration_bounds = array<i64: 2>, scalar_prefetch = 0 : i64, scratch_operands = 0 : i64, tpu.core_type = #tpu.core_type<tc>, window_params = [{transform_indices = @transform_0, window_bounds = array<i64: 1, 16, 48>}, {pipeline_mode = #tpu.pipeline_mode<synchronous>, transform_indices = @transform_1, window_bounds = array<i64: 48, 384>}, {pipeline_mode = #tpu.pipeline_mode<synchronous>, transform_indices = @transform_2, window_bounds = array<i64: 256, 16>}, {transform_indices = @transform_3, window_bounds = array<i64: 1, 3, 256, 128>}]} {
    %c0 = arith.constant 0 : index
    %c0_0 = arith.constant 0 : index
    %c0_1 = arith.constant 0 : index
    %0 = vector.load %arg1[%c0, %c0_0, %c0_1] : memref<1x16x48xf32, #tpu.memory_space<vmem>>, vector<1x16x48xf32>
    %1 = vector.shape_cast %0 : vector<1x16x48xf32> to vector<16x48xf32>
    %c0_2 = arith.constant 0 : index
    %c0_3 = arith.constant 0 : index
    %2 = vector.load %arg2[%c0_2, %c0_3] : memref<48x384xf32, #tpu.memory_space<vmem>>, vector<48x384xf32>
    %cst = arith.constant dense<0.000000e+00> : vector<16x384xf32>
    %3 = tpu.matmul %1, %2, %cst {dimension_numbers = #tpu.dot_dimension_numbers<[1], [0], [0], [1], [0, 0, 1, 1], [], []>} : vector<16x48xf32>, vector<48x384xf32>, vector<16x384xf32> -> vector<16x384xf32>
    %c0_4 = arith.constant 0 : index
    %c0_5 = arith.constant 0 : index
    %4 = vector.load %arg3[%c0_4, %c0_5] : memref<256x16xf32, #tpu.memory_space<vmem>>, vector<256x16xf32>
    %cst_6 = arith.constant dense<0.000000e+00> : vector<256x384xf32>
    %5 = tpu.matmul %4, %3, %cst_6 {dimension_numbers = #tpu.dot_dimension_numbers<[1], [0], [0], [1], [0, 0, 1, 1], [], []>} : vector<256x16xf32>, vector<16x384xf32>, vector<256x384xf32> -> vector<256x384xf32>
    %6 = vector.extract_strided_slice %5 {offsets = [0, 0], sizes = [256, 128], strides = [1, 1]} : vector<256x384xf32> to vector<256x128xf32>
    %cst_7 = arith.constant 2.1178081 : f32
    %7 = vector.broadcast %cst_7 : f32 to vector<256x128xf32>
    %8 = arith.subf %6, %7 : vector<256x128xf32>
    %c0_8 = arith.constant 0 : index
    %c0_9 = arith.constant 0 : index
    %c0_10 = arith.constant 0 : index
    %c0_11 = arith.constant 0 : index
    %9 = vector.load %arg4[%c0_8, %c0_9, %c0_10, %c0_11] : memref<1x3x256x128xf32, #tpu.memory_space<vmem>>, vector<1x1x256x128xf32>
    %10 = vector.shape_cast %9 : vector<1x1x256x128xf32> to vector<256x128xf32>
    %11 = vector.shape_cast %8 : vector<256x128xf32> to vector<1x1x256x128xf32>
    tpu.vector_store %arg4[%c0_8, %c0_9, %c0_10, %c0_11], %11 {strides = array<i32>} : memref<1x3x256x128xf32, #tpu.memory_space<vmem>>, vector<1x1x256x128xf32>,
    %12 = vector.extract_strided_slice %5 {offsets = [0, 128], sizes = [256, 128], strides = [1, 1]} : vector<256x384xf32> to vector<256x128xf32>
    %cst_12 = arith.constant 2.04446769 : f32
    %13 = vector.broadcast %cst_12 : f32 to vector<256x128xf32>
    %14 = arith.subf %12, %13 : vector<256x128xf32>
    %c0_13 = arith.constant 0 : index
    %c1 = arith.constant 1 : index
    %c0_14 = arith.constant 0 : index
    %c0_15 = arith.constant 0 : index
    %15 = vector.load %arg4[%c0_13, %c1, %c0_14, %c0_15] : memref<1x3x256x128xf32, #tpu.memory_space<vmem>>, vector<1x1x256x128xf32>
    %16 = vector.shape_cast %15 : vector<1x1x256x128xf32> to vector<256x128xf32>
    %17 = vector.shape_cast %14 : vector<256x128xf32> to vector<1x1x256x128xf32>
    tpu.vector_store %arg4[%c0_13, %c1, %c0_14, %c0_15], %17 {strides = array<i32>} : memref<1x3x256x128xf32, #tpu.memory_space<vmem>>, vector<1x1x256x128xf32>,
    %18 = vector.extract_strided_slice %5 {offsets = [0, 256], sizes = [256, 128], strides = [1, 1]} : vector<256x384xf32> to vector<256x128xf32>
    %cst_16 = arith.constant 1.8114326 : f32
    %19 = vector.broadcast %cst_16 : f32 to vector<256x128xf32>
    %20 = arith.subf %18, %19 : vector<256x128xf32>
    %c0_17 = arith.constant 0 : index
    %c2 = arith.constant 2 : index
    %c0_18 = arith.constant 0 : index
    %c0_19 = arith.constant 0 : index
    %21 = vector.load %arg4[%c0_17, %c2, %c0_18, %c0_19] : memref<1x3x256x128xf32, #tpu.memory_space<vmem>>, vector<1x1x256x128xf32>
    %22 = vector.shape_cast %21 : vector<1x1x256x128xf32> to vector<256x128xf32>
    %23 = vector.shape_cast %20 : vector<256x128xf32> to vector<1x1x256x128xf32>
    tpu.vector_store %arg4[%c0_17, %c2, %c0_18, %c0_19], %23 {strides = array<i32>} : memref<1x3x256x128xf32, #tpu.memory_space<vmem>>, vector<1x1x256x128xf32>,
    return
  }
  func.func @transform_0(%arg0: i32) -> (i32, i32, i32) {
    %c0_i32 = arith.constant 0 : i32
    %c0_i32_0 = arith.constant 0 : i32
    %c0_i32_1 = arith.constant 0 : i32
    return %arg0, %c0_i32, %c0_i32_0 : i32, i32, i32
  }
  func.func @transform_1(%arg0: i32) -> (i32, i32) {
    %c0_i32 = arith.constant 0 : i32
    %c0_i32_0 = arith.constant 0 : i32
    %c0_i32_1 = arith.constant 0 : i32
    return %c0_i32, %c0_i32_0 : i32, i32
  }
  func.func @transform_2(%arg0: i32) -> (i32, i32) {
    %c0_i32 = arith.constant 0 : i32
    %c0_i32_0 = arith.constant 0 : i32
    %c0_i32_1 = arith.constant 0 : i32
    return %c0_i32, %c0_i32_0 : i32, i32
  }
  func.func @transform_3(%arg0: i32) -> (i32, i32, i32, i32) {
    %c0_i32 = arith.constant 0 : i32
    %c0_i32_0 = arith.constant 0 : i32
    %c0_i32_1 = arith.constant 0 : i32
    %c0_i32_2 = arith.constant 0 : i32
    return %arg0, %c0_i32, %c0_i32_0, %c0_i32_1 : i32, i32, i32, i32
  }
}

</mosaic_0001>

<bundles_post_ra>
// kernel: tpu_custom_call.1
= control target key start
LH: loop header
LB: loop body
LE: loop exit
PB: predicated region body
PF: predicated region fallthrough
CT: control target
= control target key end

     0   :  { %8 = vsyncpa [#allocation3], 0  ;;  %s1933_s0 = inlined_call_operand.vmem [shape: f32[2,16,48], index: 0, kind: input, shape index: {}]   ;;  %s1934_s1 = inlined_call_operand.vmem [shape: f32[48,384], index: 1, kind: input, shape index: {}]   ;;  %s1935_s2 = inlined_call_operand.vmem [shape: f32[256,16], index: 2, kind: input, shape index: {}]   ;;  %s1936_s3 = inlined_call_operand.hbm [shape: f32[2,3,256,128], index: 3, kind: output, shape index: {}]  }
   0x1   :  { %10 = vsyncpa [#allocation3 + $0x1], 0  ;;  %s1418_s12 = smov 0   ;;  %s1420_s13 = smov 0  }
   0x2   :  { %s1422_s14 = smov 0   ;;  %s1424_s15 = smov 0  }
   0x3 LB: > { %s1439_s16 = sadd.s32 4294967295, %s1394_s15   ;;  %s1005_s17 = sadd.s32 4294967294, %s1394_s15   ;;  %s1394_s15 = sphi %s1424_s15, %s1942_s15   ;;  %s1390_s14 = sphi %s1422_s14, %s1941_s14   ;;  %s1386_s13 = sphi %s1420_s13, %s1940_s13   ;;  %s1382_s12 = sphi %s1418_s12, %s1939_s12  }
   0x4   : > { %s1443_s18 = sadd.s32 1, %s1394_s15   ;;  %s91_s19 = sadd.s32 1, %s1390_s14 }
   0x5   : > { %s88_s20 = ssub.s32 %s1394_s15, %s1443_s18  ;;  %p101_p0 = scmp.ne.s32.totalorder %s1390_s14, %s1386_s13 }
   0x6   : > { %p89_p1 = scmp.eq.s32.totalorder %s88_s20, 0  ;;  %p102_p2 = scmp.eq.s32.totalorder %s1439_s16, 1 }
   0x7   : > { %p107_p3 = scmp.ne.s32.totalorder %s1386_s13, %s1382_s12  ;;  %p108_p4 = scmp.eq.s32.totalorder %s1005_s17, 1 }
   0x8   : > { %s1454_s21 = scalar_select %p89_p1, %s1390_s14, %s91_s19  }
   0x9   : > { %p1456_p5 = por %p102_p2, %p101_p0  ;;  %p1460_p6 = por %p108_p4, %p107_p3 }
   0xa   : > { %p1008_p7 = scmp.ge.s32.totalorder %s1394_s15, 1  ;;  %p140_p8 = scmp.lt.s32.totalorder %s1394_s15, 3 }
   0xc   : > { %p141_p9 = pnand %p1008_p7, %p140_p8 }
   0xd   : > { %p164_p10 = scmp.lt.s32.totalorder (!%p141_p9), %s1439_s16, 1  ;;  %s1290_s25 = smul.u32 (!%p141_p9), 768, %s1439_s16 }
   0xe   : > { %144 = sbr.rel (%p141_p9) target bundleno = 520 (0x208), region = 32  ;;  %s1352_s8 = scalar_lea.hbm (!%p141_p9), %s1936_s3, 1536 }
   0xf   : > { %s939_s28 = scalar_lea.hbm (!%p141_p9), %s1936_s3, %s1290_s25 }
  0x10   : > { %s942_s29 = sshll.u32 (!%p141_p9), %s939_s28, 4  ;;  %s943_s29 = int_to_ptr.hbm [resolvable:$true] %s942_s29 }
  0x11   : > { %s1346_s4 = sshra.s32 (!%p141_p9), %s943_s29, 4  ;;  %s1347_s4 = int_to_ptr.hbm [resolvable:$true] %s1346_s4 }
  0x12   : > { %p1353_p0 = scmp.lt.s32.totalorder (!%p141_p9), %s1347_s4, %s1936_s3 }
  0x13   : > { %v186_v0 = vld [vmem:[%s1934_s1 + $0x78] sm:$0xff]  ;;  %v183_v1 = vld [vmem:[%s1934_s1 + $0x60] sm:$0xff]  ;;  %v180_v2 = vld [vmem:[%s1934_s1 + $0x48] sm:$0xff]  ;;  %s165_s30 = scalar_select %p164_p10, %s1439_s16, 1  ;;  %vm189_vm0 = vcmask 392192   ;;  %vm297_vm1 = vcmask 130048  }
  0x14   : > { %206 = vmatpush.msra.mxu2 %v186_v0  ;;  %v177_v3 = vld [vmem:[%s1934_s1 + $0x30] sm:$0xff]  ;;  %v187_v4 = vld [vmem:[%s1934_s1 + $0x80] sm:$0xff]  ;;  %v184_v5 = vld [vmem:[%s1934_s1 + $0x68] sm:$0xff]  ;;  %s1348_s16 = scalar_lea.hbm %s1347_s4, 768 }
  0x15   : > { %s1276_s6 = sshll.u32 %s165_s30, 4  ;;  %1277 = vmatpush.msra.mxu1 %v187_v4  ;;  %v174_v6 = vld [vmem:[%s1934_s1 + $0x18] sm:$0xff]  ;;  %229 = vmatpush.msra.mxu0 %v187_v4  ;;  %v181_v7 = vld [vmem:[%s1934_s1 + $0x50] sm:$0xff]  ;;  %v171_v8 = vld [vmem:[%s1934_s1] sm:$0xff]  ;;  %p1349_p11 = scmp.ne.s32.totalorder %s1347_s4, %s1348_s16 }
  0x16   : > { %207 = vmatpush.msra.mxu2 %v183_v1  ;;  %s168_s24 = scalar_lea.vmem %s1933_s0, %s1276_s6  ;;  %v178_v9 = vld [vmem:[%s1934_s1 + $0x38] sm:$0xff]  ;;  %v188_v11 = vld [vmem:[%s1934_s1 + $0x88] sm:$0xff]  ;;  %v175_v12 = vld [vmem:[%s1934_s1 + $0x20] sm:$0xff]  ;;  %s161_s6 = sand.u32 1, %s1386_s13  }
  0x17   : > { %1278 = vmatpush.msra.mxu1 %v184_v5  ;;  %230 = vmatpush.msra.mxu0 %v184_v5  ;;  %v169_v10 = vld [vmem:[%s168_s24] sm:$0xff]  ;;  %v185_v13 = vld [vmem:[%s1934_s1 + $0x70] sm:$0xff]  ;;  %v172_v14 = vld [vmem:[%s1934_s1 + $0x8] sm:$0xff]  ;;  %s1289_s7 = smul.u32 768, %s161_s6  ;;  %s928_s30 = scalar_lea.sflag [#allocation3], %s161_s6 }
  0x18   : > { %208 = vmatpush.msra.mxu2 %v180_v2  ;;  %v182_v15 = vld [vmem:[%s1934_s1 + $0x58] sm:$0xff]  ;;  %v170_v16 = vld [vmem:[%s168_s24 + $0x8] sm:$0xff]  ;;  %v179_v17 = vld [vmem:[%s1934_s1 + $0x40] sm:$0xff]  ;;  %p1350_p12 = pnand %p1349_p11, %p1456_p5  ;;  %p1354_p1 = scmp.lt.s32.totalorder %s1352_s8, %s1348_s16 }
  0x19   : > { %1279 = vmatpush.msra.mxu1 %v181_v7  ;;  %231 = vmatpush.msra.mxu0 %v181_v7  ;;  %v176_v18 = vld [vmem:[%s1934_s1 + $0x28] sm:$0xff]  ;;  %v173_v19 = vld [vmem:[%s1934_s1 + $0x10] sm:$0xff]  ;;  %v265_v23 = vld [vmem:[%s1935_s2] sm:$0xff]  ;;  %s1724_s10 = scalar_lea.vmem [#allocation2], %s1289_s7 }
  0x1a   : > { %209 = vmatpush.msra.mxu2 %v177_v3  ;;  %v270_v25 = vld [vmem:[%s1935_s2 + $0x28] sm:$0xff]  ;;  %v271_v28 = vld [vmem:[%s1935_s2 + $0x30] sm:$0xff]  ;;  %v272_v31 = vld [vmem:[%s1935_s2 + $0x38] sm:$0xff]  ;;  %s940_s24 = sshll.u32 %s1724_s10, 4  ;;  %p1351_p13 = pneg %p1350_p12  ;;  %s941_s24 = int_to_ptr.vmem [resolvable:$true] %s940_s24 }
  0x1b   : > { %1280 = vmatpush.msra.mxu1 %v178_v9  ;;  %232 = vmatpush.msra.mxu0 %v178_v9  ;;  %v266_v26 = vld [vmem:[%s1935_s2 + $0x8] sm:$0xff]  ;;  %v267_v29 = vld [vmem:[%s1935_s2 + $0x10] sm:$0xff]  ;;  %v268_v32 = vld [vmem:[%s1935_s2 + $0x18] sm:$0xff]  ;;  %p1355_p2 = por %p1354_p1, %p1353_p0 }
  0x1c   : > { %210 = vmatpush.msra.mxu2 %v174_v6  ;;  %v273_v33 = vld [vmem:[%s1935_s2 + $0x40] sm:$0xff]  ;;  %v274_v35 = vld [vmem:[%s1935_s2 + $0x48] sm:$0xff]  ;;  %v275_v36 = vld [vmem:[%s1935_s2 + $0x50] sm:$0xff] }
  0x1d   : > { %1281 = vmatpush.msra.mxu1 %v175_v12  ;;  %233 = vmatpush.msra.mxu0 %v175_v12  ;;  %v269_v34 = vld [vmem:[%s1935_s2 + $0x20] sm:$0xff]  ;;  %v276_v37 = vld [vmem:[%s1935_s2 + $0x58] sm:$0xff]  ;;  %v278_v40 = vld [vmem:[%s1935_s2 + $0x68] sm:$0xff]  ;;  %p1356_p3 = pnand %p1355_p2, %p1351_p13 }
  0x1e   : > { %211 = vmatpush.msra.mxu2 %v171_v8  ;;  %v277_v38 = vld [vmem:[%s1935_s2 + $0x60] sm:$0xff]  ;;  %v1611_v41 = vld [vmem:[%s1935_s2 + $0xc8] sm:$0xff]  ;;  %v279_v42 = vld [vmem:[%s1935_s2 + $0x70] sm:$0xff] }
  0x1f   : > { %1011 = vmatmul.msk.f32.vlgmr.msra.gmra.mxu2 %vm189_vm0, %v169_v10  ;;  %1282 = vmatpush.msra.mxu1 %v172_v14  ;;  %v1598_v39 = vld [vmem:[%s1935_s2 + $0xc0] sm:$0xff]  ;;  %v1624_v43 = vld [vmem:[%s1935_s2 + $0xd0] sm:$0xff]  ;;  %v280_v44 = vld [vmem:[%s1935_s2 + $0x78] sm:$0xff] }
  0x20   : > { %252 = vmatpush.msrb.mxu2 %v188_v11  ;;  %1014 = vmatmul.msk.f32.vlgmr.msra.gmra.mxu1 %vm189_vm0, %v170_v16  ;;  %v1637_v45 = vld [vmem:[%s1935_s2 + $0xd8] sm:$0xff]  ;;  %v281_v46 = vld [vmem:[%s1935_s2 + $0x80] sm:$0xff]  ;;  %v1660_v48 = vld [vmem:[%s1935_s2 + $0x88] sm:$0xff] }
  0x21   : > { %234 = vmatpush.msra.mxu0 %v172_v14  ;;  %v1650_v47 = vld [vmem:[%s1935_s2 + $0xe0] sm:$0xff]  ;;  %v1665_v49 = vld [vmem:[%s1935_s2 + $0xe8] sm:$0xff]  ;;  %v1676_v50 = vld [vmem:[%s1935_s2 + $0x90] sm:$0xff] }
  0x22   : > { %253 = vmatpush.msrb.mxu2 %v185_v13  ;;  %1013 = vmatmul.msk.f32.vlgmr.msra.gmra.mxu0 %vm189_vm0, %v169_v10  ;;  %v1681_v51 = vld [vmem:[%s1935_s2 + $0xf0] sm:$0xff]  ;;  %v1692_v52 = vld [vmem:[%s1935_s2 + $0x98] sm:$0xff]  ;;  %v1708_v54 = vld [vmem:[%s1935_s2 + $0xa0] sm:$0xff] }
  0x23   : > { %v1697_v53 = vld [vmem:[%s1935_s2 + $0xf8] sm:$0xff]  ;;  %v1722_v57 = vld [vmem:[%s1935_s2 + $0xa8] sm:$0xff]  ;;  %v1737_v62 = vld [vmem:[%s1935_s2 + $0xb0] sm:$0xff] }
  0x24   : > { %254 = vmatpush.msrb.mxu2 %v182_v15  ;;  %v1751_v3 = vld [vmem:[%s1935_s2 + $0xb8] sm:$0xff] }
  0x26   : > { %255 = vmatpush.msrb.mxu2 %v179_v17 }
  0x27   : > { %1012 = vmatmul.msk.f32.gmra.mxu2 %vm189_vm0, %v170_v16 }
  0x28   : > { %256 = vmatpush.msrb.mxu2 %v176_v18 }
  0x2a   : > { %257 = vmatpush.msrb.mxu2 %v173_v19 }
  0x2f   : > { %1015 = vmatmul.msk.f32.vlgmr.msrb.gmra.mxu2 %vm189_vm0, %v169_v10 }
  0x37   : > { %1016 = vmatmul.msk.f32.gmra.mxu2 %vm189_vm0, %v170_v16 }
  0x9d   : > { %v239_v20 = vpop.f32.mrf.mxu1 }
  0x9e   : > { %521 = vmatpush.msrb.mxu0 %v239_v20 }
  0x9f   : > { %v236_v22 = vpop.f32.mrf.mxu0 }
  0xa0   : > { %522 = vmatpush.msrb.mxu0 %v236_v22 }
  0xa1   : > { %1049 = vmatmul.msk.f32.vlgmr.msrb.gmra.mxu0 %vm297_vm1, %v265_v23 }
  0xa2   : > { %v213_v21 = vpop.f32.mrf.mxu2 }
  0xa9   : > { %1050 = vmatmul.msk.f32.gmra.mxu0 %vm297_vm1, %v266_v26 }
  0xaa   : > { %v216_v24 = vpop.f32.mrf.mxu2 }
  0xab   : > { %408 = vmatpush.msra.mxu2 %v216_v24  ;;  %1283 = vmatpush.msra.mxu3 %v216_v24 }
  0xad   : > { %409 = vmatpush.msra.mxu2 %v213_v21  ;;  %1284 = vmatpush.msra.mxu3 %v213_v21 }
  0xae   : > { %1022 = vmatmul.msk.f32.vlgmr.msra.gmra.mxu3 %vm297_vm1, %v270_v25  ;;  %1017 = vmatmul.msk.f32.vlgmr.msra.gmra.mxu2 %vm297_vm1, %v265_v23 }
  0xaf   : > { %1285 = vmatpush.msrb.mxu2 %v239_v20 }
  0xb1   : > { %1286 = vmatpush.msrb.mxu2 %v236_v22  ;;  %1051 = vmatmul.msk.f32.gmra.mxu0 %vm297_vm1, %v267_v29 }
  0xb2   : > { %v259_v27 = vpop.f32.mrf.mxu2 }
  0xb6   : > { %1023 = vmatmul.msk.f32.gmra.mxu3 %vm297_vm1, %v271_v28  ;;  %1018 = vmatmul.msk.f32.gmra.mxu2 %vm297_vm1, %v266_v26 }
  0xb9   : > { %1052 = vmatmul.msk.f32.gmra.mxu0 %vm297_vm1, %v268_v32 }
  0xba   : > { %v262_v30 = vpop.f32.mrf.mxu2 }
  0xbb   : > { %634 = vmatpush.msrb.mxu1 %v262_v30  ;;  %1287 = vmatpush.msra.mxu2 %v262_v30 }
  0xbd   : > { %635 = vmatpush.msrb.mxu1 %v259_v27  ;;  %1288 = vmatpush.msra.mxu2 %v259_v27 }
  0xbe   : > { %1024 = vmatmul.msk.f32.gmra.mxu3 %vm297_vm1, %v272_v31  ;;  %1081 = vmatmul.msk.f32.vlgmr.msrb.gmra.mxu1 %vm297_vm1, %v265_v23 }
  0xbf   : > { %1019 = vmatmul.msk.f32.gmra.mxu2 %vm297_vm1, %v267_v29 }
  0xc1   : > { %1053 = vmatmul.msk.f32.gmra.mxu0 %vm297_vm1, %v269_v34 }
  0xc6   : > { %1025 = vmatmul.msk.f32.gmra.mxu3 %vm297_vm1, %v273_v33  ;;  %1082 = vmatmul.msk.f32.gmra.mxu1 %vm297_vm1, %v266_v26 }
  0xc7   : > { %1020 = vmatmul.msk.f32.gmra.mxu2 %vm297_vm1, %v268_v32 }
  0xc9   : > { %1054 = vmatmul.msk.f32.gmra.mxu0 %vm297_vm1, %v270_v25 }
  0xce   : > { %1026 = vmatmul.msk.f32.gmra.mxu3 %vm297_vm1, %v274_v35  ;;  %1083 = vmatmul.msk.f32.gmra.mxu1 %vm297_vm1, %v267_v29 }
  0xcf   : > { %1021 = vmatmul.msk.f32.gmra.mxu2 %vm297_vm1, %v269_v34 }
  0xd1   : > { %1055 = vmatmul.msk.f32.gmra.mxu0 %vm297_vm1, %v271_v28 }
  0xd6   : > { %1027 = vmatmul.msk.f32.gmra.mxu3 %vm297_vm1, %v275_v36  ;;  %1084 = vmatmul.msk.f32.gmra.mxu1 %vm297_vm1, %v268_v32 }
  0xd7   : > { %1073 = vmatmul.msk.f32.vlgmr.msrb.gmra.mxu2 %vm297_vm1, %v1598_v39 }
  0xd9   : > { %1056 = vmatmul.msk.f32.gmra.mxu0 %vm297_vm1, %v272_v31 }
  0xde   : > { %1028 = vmatmul.msk.f32.gmra.mxu3 %vm297_vm1, %v276_v37  ;;  %1085 = vmatmul.msk.f32.gmra.mxu1 %vm297_vm1, %v269_v34 }
  0xdf   : > { %1074 = vmatmul.msk.f32.gmra.mxu2 %vm297_vm1, %v1611_v41 }
  0xe1   : > { %1057 = vmatmul.msk.f32.gmra.mxu0 %vm297_vm1, %v273_v33 }
  0xe6   : > { %1029 = vmatmul.msk.f32.gmra.mxu3 %vm297_vm1, %v277_v38  ;;  %1086 = vmatmul.msk.f32.gmra.mxu1 %vm297_vm1, %v270_v25 }
  0xe7   : > { %1075 = vmatmul.msk.f32.gmra.mxu2 %vm297_vm1, %v1624_v43 }
  0xe9   : > { %1058 = vmatmul.msk.f32.gmra.mxu0 %vm297_vm1, %v274_v35 }
  0xee   : > { %1030 = vmatmul.msk.f32.gmra.mxu3 %vm297_vm1, %v278_v40  ;;  %1087 = vmatmul.msk.f32.gmra.mxu1 %vm297_vm1, %v271_v28 }
  0xef   : > { %1076 = vmatmul.msk.f32.gmra.mxu2 %vm297_vm1, %v1637_v45 }
  0xf1   : > { %1059 = vmatmul.msk.f32.gmra.mxu0 %vm297_vm1, %v275_v36 }
  0xf6   : > { %1031 = vmatmul.msk.f32.gmra.mxu3 %vm297_vm1, %v279_v42  ;;  %1088 = vmatmul.msk.f32.gmra.mxu1 %vm297_vm1, %v272_v31 }
  0xf7   : > { %1077 = vmatmul.msk.f32.gmra.mxu2 %vm297_vm1, %v1650_v47 }
  0xf9   : > { %1060 = vmatmul.msk.f32.gmra.mxu0 %vm297_vm1, %v276_v37 }
  0xfe   : > { %1032 = vmatmul.msk.f32.gmra.mxu3 %vm297_vm1, %v280_v44  ;;  %1089 = vmatmul.msk.f32.gmra.mxu1 %vm297_vm1, %v273_v33 }
  0xff   : > { %1078 = vmatmul.msk.f32.gmra.mxu2 %vm297_vm1, %v1665_v49 }
 0x101   : > { %1061 = vmatmul.msk.f32.gmra.mxu0 %vm297_vm1, %v277_v38 }
 0x106   : > { %1033 = vmatmul.msk.f32.gmra.mxu3 %vm297_vm1, %v281_v46  ;;  %1090 = vmatmul.msk.f32.gmra.mxu1 %vm297_vm1, %v274_v35 }
 0x107   : > { %1079 = vmatmul.msk.f32.gmra.mxu2 %vm297_vm1, %v1681_v51 }
 0x109   : > { %1062 = vmatmul.msk.f32.gmra.mxu0 %vm297_vm1, %v278_v40 }
 0x10e   : > { %1034 = vmatmul.msk.f32.gmra.mxu3 %vm297_vm1, %v1660_v48  ;;  %1091 = vmatmul.msk.f32.gmra.mxu1 %vm297_vm1, %v275_v36 }
 0x10f   : > { %1080 = vmatmul.msk.f32.gmra.mxu2 %vm297_vm1, %v1697_v53 }
 0x111   : > { %1063 = vmatmul.msk.f32.gmra.mxu0 %vm297_vm1, %v279_v42 }
 0x116   : > { %1035 = vmatmul.msk.f32.gmra.mxu3 %vm297_vm1, %v1676_v50  ;;  %1092 = vmatmul.msk.f32.gmra.mxu1 %vm297_vm1, %v276_v37 }
 0x117   : > { %1105 = vmatmul.msk.f32.vlgmr.msra.gmra.mxu2 %vm297_vm1, %v1598_v39 }
 0x119   : > { %1064 = vmatmul.msk.f32.gmra.mxu0 %vm297_vm1, %v280_v44 }
 0x11e   : > { %1036 = vmatmul.msk.f32.gmra.mxu3 %vm297_vm1, %v1692_v52  ;;  %1093 = vmatmul.msk.f32.gmra.mxu1 %vm297_vm1, %v277_v38  ;;  %v524_v55 = vpop.f32.mrf.mxu0 }
 0x11f   : > { %v1145_v56 = vadd.f32 -2.0444677, %v524_v55  ;;  %1106 = vmatmul.msk.f32.gmra.mxu2 %vm297_vm1, %v1611_v41 }
 0x121   : > { %1065 = vmatmul.msk.f32.gmra.mxu0 %vm297_vm1, %v281_v46  ;;  %1177 = vst [vmem:[%s1724_s10 + $0x100] sm:$0xff] %v1145_v56 }
 0x126   : > { %1037 = vmatmul.msk.f32.gmra.mxu3 %vm297_vm1, %v1708_v54  ;;  %1094 = vmatmul.msk.f32.gmra.mxu1 %vm297_vm1, %v278_v40  ;;  %v527_v59 = vpop.f32.mrf.mxu0 }
 0x127   : > { %v1146_v61 = vadd.f32 -2.0444677, %v527_v59  ;;  %1107 = vmatmul.msk.f32.gmra.mxu2 %vm297_vm1, %v1624_v43 }
 0x129   : > { %1066 = vmatmul.msk.f32.gmra.mxu0 %vm297_vm1, %v1660_v48  ;;  %1178 = vst [vmem:[%s1724_s10 + $0x108] sm:$0xff] %v1146_v61 }
 0x12e   : > { %1038 = vmatmul.msk.f32.gmra.mxu3 %vm297_vm1, %v1722_v57  ;;  %1095 = vmatmul.msk.f32.gmra.mxu1 %vm297_vm1, %v279_v42  ;;  %v530_v0 = vpop.f32.mrf.mxu0 }
 0x12f   : > { %v1147_v2 = vadd.f32 -2.0444677, %v530_v0  ;;  %1108 = vmatmul.msk.f32.gmra.mxu2 %vm297_vm1, %v1637_v45 }
 0x131   : > { %v426_v58 = vpop.f32.mrf.mxu3  ;;  %1067 = vmatmul.msk.f32.gmra.mxu0 %vm297_vm1, %v1676_v50  ;;  %1179 = vst [vmem:[%s1724_s10 + $0x110] sm:$0xff] %v1147_v2  ;;  %v411_v6 = vpop.f32.mrf.mxu2 }
 0x132   : > { %v1118_v60 = vadd.f32 -2.117808, %v426_v58  ;;  %v1113_v7 = vadd.f32 -2.117808, %v411_v6 }
 0x134   : > { %770 = vst [vmem:[%s1724_s10 + $0x28] sm:$0xff] %v1118_v60 }
 0x135   : > { %765 = vst [vmem:[%s1724_s10] sm:$0xff] %v1113_v7 }
 0x136   : > { %1039 = vmatmul.msk.f32.gmra.mxu3 %vm297_vm1, %v1737_v62  ;;  %1096 = vmatmul.msk.f32.gmra.mxu1 %vm297_vm1, %v280_v44  ;;  %v533_v9 = vpop.f32.mrf.mxu0 }
 0x137   : > { %v1148_v11 = vadd.f32 -2.0444677, %v533_v9  ;;  %1109 = vmatmul.msk.f32.gmra.mxu2 %vm297_vm1, %v1650_v47 }
 0x139   : > { %v429_v63 = vpop.f32.mrf.mxu3  ;;  %1068 = vmatmul.msk.f32.gmra.mxu0 %vm297_vm1, %v1692_v52  ;;  %1180 = vst [vmem:[%s1724_s10 + $0x118] sm:$0xff] %v1148_v11  ;;  %v414_v14 = vpop.f32.mrf.mxu2 }
 0x13a   : > { %v1119_v1 = vadd.f32 -2.117808, %v429_v63  ;;  %v1114_v15 = vadd.f32 -2.117808, %v414_v14 }
 0x13b   : > { %v637_v4 = vpop.f32.mrf.mxu1 }
 0x13c   : > { %771 = vst [vmem:[%s1724_s10 + $0x30] sm:$0xff] %v1119_v1  ;;  %v1209_v5 = vadd.f32 -1.8114326, %v637_v4 }
 0x13d   : > { %766 = vst [vmem:[%s1724_s10 + $0x8] sm:$0xff] %v1114_v15 }
 0x13e   : > { %1040 = vmatmul.msk.f32.gmra.mxu3 %vm297_vm1, %v1751_v3  ;;  %1241 = vst [vmem:[%s1724_s10 + $0x200] sm:$0xff] %v1209_v5  ;;  %1097 = vmatmul.msk.f32.gmra.mxu1 %vm297_vm1, %v281_v46  ;;  %v536_v17 = vpop.f32.mrf.mxu0 }
 0x13f   : > { %v1149_v19 = vadd.f32 -2.0444677, %v536_v17  ;;  %1110 = vmatmul.msk.f32.gmra.mxu2 %vm297_vm1, %v1665_v49 }
 0x141   : > { %v432_v8 = vpop.f32.mrf.mxu3  ;;  %1069 = vmatmul.msk.f32.gmra.mxu0 %vm297_vm1, %v1708_v54  ;;  %1181 = vst [vmem:[%s1724_s10 + $0x120] sm:$0xff] %v1149_v19 }
 0x142   : > { %v1120_v10 = vadd.f32 -2.117808, %v432_v8  ;;  %v417_v22 = vpop.f32.mrf.mxu2 }
 0x143   : > { %v640_v12 = vpop.f32.mrf.mxu1  ;;  %v1115_v23 = vadd.f32 -2.117808, %v417_v22 }
 0x144   : > { %772 = vst [vmem:[%s1724_s10 + $0x38] sm:$0xff] %v1120_v10  ;;  %v1210_v13 = vadd.f32 -1.8114326, %v640_v12 }
 0x145   : > { %767 = vst [vmem:[%s1724_s10 + $0x10] sm:$0xff] %v1115_v23 }
 0x146   : > { %1041 = vmatmul.msk.f32.gmra.mxu3 %vm297_vm1, %v1598_v39  ;;  %1242 = vst [vmem:[%s1724_s10 + $0x208] sm:$0xff] %v1210_v13  ;;  %1098 = vmatmul.msk.f32.gmra.mxu1 %vm297_vm1, %v1660_v48  ;;  %v539_v25 = vpop.f32.mrf.mxu0 }
 0x147   : > { %v1150_v27 = vadd.f32 -2.0444677, %v539_v25  ;;  %1111 = vmatmul.msk.f32.gmra.mxu2 %vm297_vm1, %v1681_v51 }
 0x149   : > { %v435_v16 = vpop.f32.mrf.mxu3  ;;  %1070 = vmatmul.msk.f32.gmra.mxu0 %vm297_vm1, %v1722_v57  ;;  %1182 = vst [vmem:[%s1724_s10 + $0x128] sm:$0xff] %v1150_v27 }
 0x14a   : > { %v1121_v18 = vadd.f32 -2.117808, %v435_v16  ;;  %v420_v30 = vpop.f32.mrf.mxu2 }
 0x14b   : > { %v643_v20 = vpop.f32.mrf.mxu1  ;;  %v1116_v31 = vadd.f32 -2.117808, %v420_v30 }
 0x14c   : > { %773 = vst [vmem:[%s1724_s10 + $0x40] sm:$0xff] %v1121_v18  ;;  %v1211_v21 = vadd.f32 -1.8114326, %v643_v20 }
 0x14d   : > { %768 = vst [vmem:[%s1724_s10 + $0x18] sm:$0xff] %v1116_v31 }
 0x14e   : > { %1042 = vmatmul.msk.f32.gmra.mxu3 %vm297_vm1, %v1611_v41  ;;  %1243 = vst [vmem:[%s1724_s10 + $0x210] sm:$0xff] %v1211_v21  ;;  %1099 = vmatmul.msk.f32.gmra.mxu1 %vm297_vm1, %v1676_v50  ;;  %v542_v33 = vpop.f32.mrf.mxu0 }
 0x14f   : > { %v1151_v35 = vadd.f32 -2.0444677, %v542_v33  ;;  %1112 = vmatmul.msk.f32.gmra.mxu2 %vm297_vm1, %v1697_v53 }
 0x151   : > { %v438_v24 = vpop.f32.mrf.mxu3  ;;  %1071 = vmatmul.msk.f32.gmra.mxu0 %vm297_vm1, %v1737_v62  ;;  %1183 = vst [vmem:[%s1724_s10 + $0x130] sm:$0xff] %v1151_v35 }
 0x152   : > { %v1122_v26 = vadd.f32 -2.117808, %v438_v24  ;;  %v423_v38 = vpop.f32.mrf.mxu2 }
 0x153   : > { %v646_v28 = vpop.f32.mrf.mxu1  ;;  %v1117_v39 = vadd.f32 -2.117808, %v423_v38 }
 0x154   : > { %774 = vst [vmem:[%s1724_s10 + $0x48] sm:$0xff] %v1122_v26  ;;  %v1212_v29 = vadd.f32 -1.8114326, %v646_v28 }
 0x155   : > { %769 = vst [vmem:[%s1724_s10 + $0x20] sm:$0xff] %v1117_v39 }
 0x156   : > { %1043 = vmatmul.msk.f32.gmra.mxu3 %vm297_vm1, %v1624_v43  ;;  %1244 = vst [vmem:[%s1724_s10 + $0x218] sm:$0xff] %v1212_v29  ;;  %1100 = vmatmul.msk.f32.gmra.mxu1 %vm297_vm1, %v1692_v52  ;;  %v545_v41 = vpop.f32.mrf.mxu0 }
 0x157   : > { %v1152_v43 = vadd.f32 -2.0444677, %v545_v41 }
 0x159   : > { %v441_v32 = vpop.f32.mrf.mxu3  ;;  %1072 = vmatmul.msk.f32.gmra.mxu0 %vm297_vm1, %v1751_v3  ;;  %1184 = vst [vmem:[%s1724_s10 + $0x138] sm:$0xff] %v1152_v43 }
 0x15a   : > { %v1123_v34 = vadd.f32 -2.117808, %v441_v32 }
 0x15b   : > { %v649_v36 = vpop.f32.mrf.mxu1 }
 0x15c   : > { %775 = vst [vmem:[%s1724_s10 + $0x50] sm:$0xff] %v1123_v34  ;;  %v1213_v37 = vadd.f32 -1.8114326, %v649_v36 }
 0x15e   : > { %1044 = vmatmul.msk.f32.gmra.mxu3 %vm297_vm1, %v1637_v45  ;;  %1245 = vst [vmem:[%s1724_s10 + $0x220] sm:$0xff] %v1213_v37  ;;  %1101 = vmatmul.msk.f32.gmra.mxu1 %vm297_vm1, %v1708_v54  ;;  %v548_v48 = vpop.f32.mrf.mxu0  ;;  %v596_v54 = vpop.f32.mrf.mxu2 }
 0x15f   : > { %v1153_v52 = vadd.f32 -2.0444677, %v548_v48  ;;  %v1169_v56 = vadd.f32 -2.0444677, %v596_v54 }
 0x161   : > { %v444_v40 = vpop.f32.mrf.mxu3  ;;  %1185 = vst [vmem:[%s1724_s10 + $0x140] sm:$0xff] %v1153_v52 }
 0x162   : > { %v1124_v42 = vadd.f32 -2.117808, %v444_v40  ;;  %1201 = vst [vmem:[%s1724_s10 + $0x1c0] sm:$0xff] %v1169_v56 }
 0x163   : > { %v652_v44 = vpop.f32.mrf.mxu1 }
 0x164   : > { %776 = vst [vmem:[%s1724_s10 + $0x58] sm:$0xff] %v1124_v42  ;;  %v1214_v45 = vadd.f32 -1.8114326, %v652_v44 }
 0x166   : > { %1045 = vmatmul.msk.f32.gmra.mxu3 %vm297_vm1, %v1650_v47  ;;  %1246 = vst [vmem:[%s1724_s10 + $0x228] sm:$0xff] %v1214_v45  ;;  %1102 = vmatmul.msk.f32.gmra.mxu1 %vm297_vm1, %v1722_v57  ;;  %v551_v57 = vpop.f32.mrf.mxu0  ;;  %v599_v61 = vpop.f32.mrf.mxu2 }
 0x167   : > { %v1154_v60 = vadd.f32 -2.0444677, %v551_v57  ;;  %v1170_v0 = vadd.f32 -2.0444677, %v599_v61 }
 0x169   : > { %v447_v46 = vpop.f32.mrf.mxu3  ;;  %1186 = vst [vmem:[%s1724_s10 + $0x148] sm:$0xff] %v1154_v60 }
 0x16a   : > { %v1125_v50 = vadd.f32 -2.117808, %v447_v46  ;;  %1202 = vst [vmem:[%s1724_s10 + $0x1c8] sm:$0xff] %v1170_v0 }
 0x16b   : > { %v655_v55 = vpop.f32.mrf.mxu1 }
 0x16c   : > { %777 = vst [vmem:[%s1724_s10 + $0x60] sm:$0xff] %v1125_v50  ;;  %v1215_v58 = vadd.f32 -1.8114326, %v655_v55 }
 0x16e   : > { %1046 = vmatmul.msk.f32.gmra.mxu3 %vm297_vm1, %v1665_v49  ;;  %1247 = vst [vmem:[%s1724_s10 + $0x230] sm:$0xff] %v1215_v58  ;;  %1103 = vmatmul.msk.f32.gmra.mxu1 %vm297_vm1, %v1737_v62  ;;  %v554_v62 = vpop.f32.mrf.mxu0  ;;  %v602_v5 = vpop.f32.mrf.mxu2 }
 0x16f   : > { %v1155_v4 = vadd.f32 -2.0444677, %v554_v62  ;;  %v1171_v7 = vadd.f32 -2.0444677, %v602_v5 }
 0x171   : > { %v450_v47 = vpop.f32.mrf.mxu3  ;;  %1187 = vst [vmem:[%s1724_s10 + $0x150] sm:$0xff] %v1155_v4 }
 0x172   : > { %v1126_v59 = vadd.f32 -2.117808, %v450_v47  ;;  %1203 = vst [vmem:[%s1724_s10 + $0x1d0] sm:$0xff] %v1171_v7 }
 0x173   : > { %v658_v63 = vpop.f32.mrf.mxu1 }
 0x174   : > { %778 = vst [vmem:[%s1724_s10 + $0x68] sm:$0xff] %v1126_v59  ;;  %v1216_v1 = vadd.f32 -1.8114326, %v658_v63 }
 0x176   : > { %1047 = vmatmul.msk.f32.gmra.mxu3 %vm297_vm1, %v1681_v51  ;;  %1248 = vst [vmem:[%s1724_s10 + $0x238] sm:$0xff] %v1216_v1  ;;  %1104 = vmatmul.msk.f32.gmra.mxu1 %vm297_vm1, %v1751_v3  ;;  %v557_v3 = vpop.f32.mrf.mxu0  ;;  %v605_v11 = vpop.f32.mrf.mxu2 }
 0x177   : > { %v1156_v10 = vadd.f32 -2.0444677, %v557_v3  ;;  %v1172_v13 = vadd.f32 -2.0444677, %v605_v11 }
 0x179   : > { %v453_v49 = vpop.f32.mrf.mxu3  ;;  %1188 = vst [vmem:[%s1724_s10 + $0x158] sm:$0xff] %v1156_v10 }
 0x17a   : > { %v1127_v2 = vadd.f32 -2.117808, %v453_v49  ;;  %1204 = vst [vmem:[%s1724_s10 + $0x1d8] sm:$0xff] %v1172_v13 }
 0x17b   : > { %v661_v6 = vpop.f32.mrf.mxu1 }
 0x17c   : > { %779 = vst [vmem:[%s1724_s10 + $0x70] sm:$0xff] %v1127_v2  ;;  %v1217_v8 = vadd.f32 -1.8114326, %v661_v6 }
 0x17e   : > { %1048 = vmatmul.msk.f32.gmra.mxu3 %vm297_vm1, %v1697_v53  ;;  %1249 = vst [vmem:[%s1724_s10 + $0x240] sm:$0xff] %v1217_v8  ;;  %v560_v53 = vpop.f32.mrf.mxu0  ;;  %v608_v18 = vpop.f32.mrf.mxu2 }
 0x17f   : > { %v1157_v17 = vadd.f32 -2.0444677, %v560_v53  ;;  %v1173_v20 = vadd.f32 -2.0444677, %v608_v18 }
 0x181   : > { %v456_v51 = vpop.f32.mrf.mxu3  ;;  %1189 = vst [vmem:[%s1724_s10 + $0x160] sm:$0xff] %v1157_v17 }
 0x182   : > { %v1128_v9 = vadd.f32 -2.117808, %v456_v51  ;;  %1205 = vst [vmem:[%s1724_s10 + $0x1e0] sm:$0xff] %v1173_v20 }
 0x183   : > { %v664_v12 = vpop.f32.mrf.mxu1 }
 0x184   : > { %780 = vst [vmem:[%s1724_s10 + $0x78] sm:$0xff] %v1128_v9  ;;  %v1218_v14 = vadd.f32 -1.8114326, %v664_v12 }
 0x186   : > { %1250 = vst [vmem:[%s1724_s10 + $0x248] sm:$0xff] %v1218_v14  ;;  %v563_v23 = vpop.f32.mrf.mxu0  ;;  %v611_v26 = vpop.f32.mrf.mxu2 }
 0x187   : > { %v1158_v25 = vadd.f32 -2.0444677, %v563_v23  ;;  %v1174_v28 = vadd.f32 -2.0444677, %v611_v26 }
 0x189   : > { %v459_v15 = vpop.f32.mrf.mxu3  ;;  %1190 = vst [vmem:[%s1724_s10 + $0x168] sm:$0xff] %v1158_v25 }
 0x18a   : > { %v1129_v16 = vadd.f32 -2.117808, %v459_v15  ;;  %1206 = vst [vmem:[%s1724_s10 + $0x1e8] sm:$0xff] %v1174_v28 }
 0x18b   : > { %v667_v19 = vpop.f32.mrf.mxu1 }
 0x18c   : > { %781 = vst [vmem:[%s1724_s10 + $0x80] sm:$0xff] %v1129_v16  ;;  %v1219_v21 = vadd.f32 -1.8114326, %v667_v19 }
 0x18e   : > { %1251 = vst [vmem:[%s1724_s10 + $0x250] sm:$0xff] %v1219_v21  ;;  %v566_v31 = vpop.f32.mrf.mxu0  ;;  %v614_v34 = vpop.f32.mrf.mxu2 }
 0x18f   : > { %v1159_v33 = vadd.f32 -2.0444677, %v566_v31  ;;  %v1175_v36 = vadd.f32 -2.0444677, %v614_v34 }
 0x191   : > { %v462_v22 = vpop.f32.mrf.mxu3  ;;  %1191 = vst [vmem:[%s1724_s10 + $0x170] sm:$0xff] %v1159_v33 }
 0x192   : > { %v1130_v24 = vadd.f32 -2.117808, %v462_v22  ;;  %1207 = vst [vmem:[%s1724_s10 + $0x1f0] sm:$0xff] %v1175_v36 }
 0x193   : > { %v670_v27 = vpop.f32.mrf.mxu1 }
 0x194   : > { %782 = vst [vmem:[%s1724_s10 + $0x88] sm:$0xff] %v1130_v24  ;;  %v1220_v29 = vadd.f32 -1.8114326, %v670_v27 }
 0x196   : > { %1252 = vst [vmem:[%s1724_s10 + $0x258] sm:$0xff] %v1220_v29  ;;  %v569_v39 = vpop.f32.mrf.mxu0  ;;  %v617_v42 = vpop.f32.mrf.mxu2 }
 0x197   : > { %v1160_v41 = vadd.f32 -2.0444677, %v569_v39  ;;  %v1176_v44 = vadd.f32 -2.0444677, %v617_v42 }
 0x199   : > { %v465_v30 = vpop.f32.mrf.mxu3  ;;  %1192 = vst [vmem:[%s1724_s10 + $0x178] sm:$0xff] %v1160_v41 }
 0x19a   : > { %v1131_v32 = vadd.f32 -2.117808, %v465_v30  ;;  %1208 = vst [vmem:[%s1724_s10 + $0x1f8] sm:$0xff] %v1176_v44 }
 0x19b   : > { %v673_v35 = vpop.f32.mrf.mxu1 }
 0x19c   : > { %783 = vst [vmem:[%s1724_s10 + $0x90] sm:$0xff] %v1131_v32  ;;  %v1221_v37 = vadd.f32 -1.8114326, %v673_v35 }
 0x19e   : > { %1253 = vst [vmem:[%s1724_s10 + $0x260] sm:$0xff] %v1221_v37  ;;  %v572_v48 = vpop.f32.mrf.mxu0  ;;  %v709_v54 = vpop.f32.mrf.mxu2 }
 0x19f   : > { %v1161_v52 = vadd.f32 -2.0444677, %v572_v48  ;;  %v1233_v56 = vadd.f32 -1.8114326, %v709_v54 }
 0x1a1   : > { %v468_v38 = vpop.f32.mrf.mxu3  ;;  %1193 = vst [vmem:[%s1724_s10 + $0x180] sm:$0xff] %v1161_v52 }
 0x1a2   : > { %v1132_v40 = vadd.f32 -2.117808, %v468_v38  ;;  %1265 = vst [vmem:[%s1724_s10 + $0x2c0] sm:$0xff] %v1233_v56 }
 0x1a3   : > { %v676_v43 = vpop.f32.mrf.mxu1 }
 0x1a4   : > { %784 = vst [vmem:[%s1724_s10 + $0x98] sm:$0xff] %v1132_v40  ;;  %v1222_v45 = vadd.f32 -1.8114326, %v676_v43 }
 0x1a6   : > { %1254 = vst [vmem:[%s1724_s10 + $0x268] sm:$0xff] %v1222_v45  ;;  %v575_v57 = vpop.f32.mrf.mxu0  ;;  %v712_v61 = vpop.f32.mrf.mxu2 }
 0x1a7   : > { %v1162_v60 = vadd.f32 -2.0444677, %v575_v57  ;;  %v1234_v0 = vadd.f32 -1.8114326, %v712_v61 }
 0x1a9   : > { %v471_v46 = vpop.f32.mrf.mxu3  ;;  %1194 = vst [vmem:[%s1724_s10 + $0x188] sm:$0xff] %v1162_v60 }
 0x1aa   : > { %v1133_v50 = vadd.f32 -2.117808, %v471_v46  ;;  %1266 = vst [vmem:[%s1724_s10 + $0x2c8] sm:$0xff] %v1234_v0 }
 0x1ab   : > { %v679_v55 = vpop.f32.mrf.mxu1 }
 0x1ac   : > { %785 = vst [vmem:[%s1724_s10 + $0xa0] sm:$0xff] %v1133_v50  ;;  %v1223_v58 = vadd.f32 -1.8114326, %v679_v55 }
 0x1ae   : > { %1255 = vst [vmem:[%s1724_s10 + $0x270] sm:$0xff] %v1223_v58  ;;  %v578_v62 = vpop.f32.mrf.mxu0  ;;  %v715_v5 = vpop.f32.mrf.mxu2 }
 0x1af   : > { %v1163_v4 = vadd.f32 -2.0444677, %v578_v62  ;;  %v1235_v7 = vadd.f32 -1.8114326, %v715_v5 }
 0x1b1   : > { %v474_v47 = vpop.f32.mrf.mxu3  ;;  %1195 = vst [vmem:[%s1724_s10 + $0x190] sm:$0xff] %v1163_v4 }
 0x1b2   : > { %v1134_v59 = vadd.f32 -2.117808, %v474_v47  ;;  %1267 = vst [vmem:[%s1724_s10 + $0x2d0] sm:$0xff] %v1235_v7 }
 0x1b3   : > { %v682_v63 = vpop.f32.mrf.mxu1 }
 0x1b4   : > { %786 = vst [vmem:[%s1724_s10 + $0xa8] sm:$0xff] %v1134_v59  ;;  %v1224_v1 = vadd.f32 -1.8114326, %v682_v63 }
 0x1b6   : > { %1256 = vst [vmem:[%s1724_s10 + $0x278] sm:$0xff] %v1224_v1  ;;  %v581_v3 = vpop.f32.mrf.mxu0  ;;  %v718_v11 = vpop.f32.mrf.mxu2 }
 0x1b7   : > { %v1164_v10 = vadd.f32 -2.0444677, %v581_v3  ;;  %v1236_v13 = vadd.f32 -1.8114326, %v718_v11 }
 0x1b9   : > { %v477_v49 = vpop.f32.mrf.mxu3  ;;  %1196 = vst [vmem:[%s1724_s10 + $0x198] sm:$0xff] %v1164_v10 }
 0x1ba   : > { %v1135_v2 = vadd.f32 -2.117808, %v477_v49  ;;  %1268 = vst [vmem:[%s1724_s10 + $0x2d8] sm:$0xff] %v1236_v13 }
 0x1bb   : > { %v685_v6 = vpop.f32.mrf.mxu1 }
 0x1bc   : > { %787 = vst [vmem:[%s1724_s10 + $0xb0] sm:$0xff] %v1135_v2  ;;  %v1225_v8 = vadd.f32 -1.8114326, %v685_v6 }
 0x1be   : > { %1257 = vst [vmem:[%s1724_s10 + $0x280] sm:$0xff] %v1225_v8  ;;  %v584_v53 = vpop.f32.mrf.mxu0  ;;  %v721_v18 = vpop.f32.mrf.mxu2 }
 0x1bf   : > { %v1165_v17 = vadd.f32 -2.0444677, %v584_v53  ;;  %v1237_v20 = vadd.f32 -1.8114326, %v721_v18 }
 0x1c1   : > { %v480_v51 = vpop.f32.mrf.mxu3  ;;  %1197 = vst [vmem:[%s1724_s10 + $0x1a0] sm:$0xff] %v1165_v17 }
 0x1c2   : > { %v1136_v9 = vadd.f32 -2.117808, %v480_v51  ;;  %1269 = vst [vmem:[%s1724_s10 + $0x2e0] sm:$0xff] %v1237_v20 }
 0x1c3   : > { %v688_v12 = vpop.f32.mrf.mxu1 }
 0x1c4   : > { %788 = vst [vmem:[%s1724_s10 + $0xb8] sm:$0xff] %v1136_v9  ;;  %v1226_v14 = vadd.f32 -1.8114326, %v688_v12 }
 0x1c6   : > { %1258 = vst [vmem:[%s1724_s10 + $0x288] sm:$0xff] %v1226_v14  ;;  %v587_v23 = vpop.f32.mrf.mxu0  ;;  %v724_v26 = vpop.f32.mrf.mxu2 }
 0x1c7   : > { %v1166_v25 = vadd.f32 -2.0444677, %v587_v23  ;;  %v1238_v28 = vadd.f32 -1.8114326, %v724_v26 }
 0x1c9   : > { %v483_v15 = vpop.f32.mrf.mxu3  ;;  %1198 = vst [vmem:[%s1724_s10 + $0x1a8] sm:$0xff] %v1166_v25 }
 0x1ca   : > { %v1137_v16 = vadd.f32 -2.117808, %v483_v15  ;;  %1270 = vst [vmem:[%s1724_s10 + $0x2e8] sm:$0xff] %v1238_v28 }
 0x1cb   : > { %v691_v19 = vpop.f32.mrf.mxu1 }
 0x1cc   : > { %789 = vst [vmem:[%s1724_s10 + $0xc0] sm:$0xff] %v1137_v16  ;;  %v1227_v21 = vadd.f32 -1.8114326, %v691_v19 }
 0x1ce   : > { %1259 = vst [vmem:[%s1724_s10 + $0x290] sm:$0xff] %v1227_v21  ;;  %v590_v31 = vpop.f32.mrf.mxu0  ;;  %v727_v34 = vpop.f32.mrf.mxu2 }
 0x1cf   : > { %v1167_v33 = vadd.f32 -2.0444677, %v590_v31  ;;  %v1239_v36 = vadd.f32 -1.8114326, %v727_v34 }
 0x1d1   : > { %v486_v22 = vpop.f32.mrf.mxu3  ;;  %1199 = vst [vmem:[%s1724_s10 + $0x1b0] sm:$0xff] %v1167_v33 }
 0x1d2   : > { %v1138_v24 = vadd.f32 -2.117808, %v486_v22  ;;  %1271 = vst [vmem:[%s1724_s10 + $0x2f0] sm:$0xff] %v1239_v36 }
 0x1d3   : > { %v694_v27 = vpop.f32.mrf.mxu1 }
 0x1d4   : > { %790 = vst [vmem:[%s1724_s10 + $0xc8] sm:$0xff] %v1138_v24  ;;  %v1228_v29 = vadd.f32 -1.8114326, %v694_v27 }
 0x1d6   : > { %1260 = vst [vmem:[%s1724_s10 + $0x298] sm:$0xff] %v1228_v29  ;;  %v593_v39 = vpop.f32.mrf.mxu0  ;;  %v730_v42 = vpop.f32.mrf.mxu2 }
 0x1d7   : > { %v1168_v41 = vadd.f32 -2.0444677, %v593_v39  ;;  %v1240_v44 = vadd.f32 -1.8114326, %v730_v42 }
 0x1d9   : > { %v489_v30 = vpop.f32.mrf.mxu3  ;;  %1200 = vst [vmem:[%s1724_s10 + $0x1b8] sm:$0xff] %v1168_v41 }
 0x1da   : > { %v1139_v32 = vadd.f32 -2.117808, %v489_v30  ;;  %1272 = vst [vmem:[%s1724_s10 + $0x2f8] sm:$0xff] %v1240_v44 }
 0x1db   : > { %v697_v35 = vpop.f32.mrf.mxu1 }
 0x1dc   : > { %791 = vst [vmem:[%s1724_s10 + $0xd0] sm:$0xff] %v1139_v32  ;;  %v1229_v37 = vadd.f32 -1.8114326, %v697_v35 }
 0x1de   : > { %1261 = vst [vmem:[%s1724_s10 + $0x2a0] sm:$0xff] %v1229_v37 }
 0x1e1   : > { %v492_v38 = vpop.f32.mrf.mxu3 }
 0x1e2   : > { %v1140_v40 = vadd.f32 -2.117808, %v492_v38 }
 0x1e3   : > { %v700_v43 = vpop.f32.mrf.mxu1 }
 0x1e4   : > { %792 = vst [vmem:[%s1724_s10 + $0xd8] sm:$0xff] %v1140_v40  ;;  %v1230_v45 = vadd.f32 -1.8114326, %v700_v43 }
 0x1e6   : > { %1262 = vst [vmem:[%s1724_s10 + $0x2a8] sm:$0xff] %v1230_v45 }
 0x1e9   : > { %v495_v46 = vpop.f32.mrf.mxu3 }
 0x1ea   : > { %v1141_v48 = vadd.f32 -2.117808, %v495_v46 }
 0x1eb   : > { %v703_v50 = vpop.f32.mrf.mxu1 }
 0x1ec   : > { %793 = vst [vmem:[%s1724_s10 + $0xe0] sm:$0xff] %v1141_v48  ;;  %v1231_v52 = vadd.f32 -1.8114326, %v703_v50 }
 0x1ee   : > { %1263 = vst [vmem:[%s1724_s10 + $0x2b0] sm:$0xff] %v1231_v52 }
 0x1f1   : > { %v498_v54 = vpop.f32.mrf.mxu3 }
 0x1f2   : > { %v1142_v55 = vadd.f32 -2.117808, %v498_v54 }
 0x1f3   : > { %v706_v56 = vpop.f32.mrf.mxu1 }
 0x1f4   : > { %794 = vst [vmem:[%s1724_s10 + $0xe8] sm:$0xff] %v1142_v55  ;;  %v1232_v58 = vadd.f32 -1.8114326, %v706_v56 }
 0x1f6   : > { %1264 = vst [vmem:[%s1724_s10 + $0x2b8] sm:$0xff] %v1232_v58 }
 0x1f9   : > { %v501_v47 = vpop.f32.mrf.mxu3 }
 0x1fa   : > { %v1143_v57 = vadd.f32 -2.117808, %v501_v47 }
 0x1fc   : > { %795 = vst [vmem:[%s1724_s10 + $0xf0] sm:$0xff] %v1143_v57 }
 0x201   : > { %v504_v59 = vpop.f32.mrf.mxu3 }
 0x202   : > { %v1144_v60 = vadd.f32 -2.117808, %v504_v59 }
 0x204   : > { %796 = vst [vmem:[%s1724_s10 + $0xf8] sm:$0xff] %v1144_v60 }
 0x205   : > { %1359 = shalt.err (!%p1356_p3)
}
 0x206   : > { %s1396_s6 = smov 128   ;;  %s1397_s10 = smov 8  }
 0x207   : > { %1291 = dma.vmem_to_hbm [thread:$0]  (%p1456_p5), %s941_s24, 12288, %s943_s29, %s928_s30, %s1396_s6, %s1396_s6, %s1397_s10  }
 0x208 PF: > { %p1297_p4 = scmp.ge.s32.totalorder %s1394_s15, 2  ;;  %s957_s17 = sand.u32 1, %s1382_s12  }
 0x209   : > { %s958_s19 = scalar_lea.sflag [#allocation3], %s957_s17 }
 0x20a   : > { %p1294_p7 = pnand %p1297_p4, %p1460_p6 }
 0x20c   : > { %p1295_p8 = pneg %p1294_p7 }
 0x20e   : > { %1377 = dma.done.wait (%p1295_p8), %s958_s19, 12288  }
 0x20f   : > { %1379 = vsyncadd (%p1295_p8), %s958_s19, 4294955008  ;;  %p13_p9 = scmp.ge.s32.totalorder %s1443_s18, 4   ;;  %s1939_s12 = smov %s1386_s13 }
 0x210   : > { %s1940_s13 = smov %s1390_s14  ;;  %s1941_s14 = smov %s1454_s21 }
 0x211   : > { %s1942_s15 = smov %s1443_s18  ;;  %15 = sbr.rel (!%p13_p9) target bundleno = 3 (0x3), region = 69 }
 0x216   :  { %964 = vsyncpa [#allocation3], 1 }
 0x217   :  { %966 = vsyncpa [#allocation3 + $0x1], 1 }

</bundles_post_ra>
